<compile_context>
chip_gen: v7x
topology: tpu7x:2x2x1
jax: 0.10.0
libtpu: 0.0.40
codegen_flags: <defaults>
</compile_context>

<pallas_src>
import jax
import jax.numpy as jnp
from jax.experimental import pallas as pl
from jax.experimental.pallas import tpu as pltpu


# ---------------------------------------------------------------------------
# VMEM budget helper (per-generation sizing; fallback = v7x per-TC 64 MiB).
# ---------------------------------------------------------------------------
def _vmem_budget_bytes():
    try:
        return int(pltpu.get_tpu_info().vmem_capacity_bytes)
    except Exception:
        return 64 * 1024 * 1024


# ---------------------------------------------------------------------------
# Generic tiled matmul + bias kernel (input projection and vocab projection,
# both hoisted out of the sequential recurrence).  Operands bf16, accum f32.
# ---------------------------------------------------------------------------
def _matmul_bias_kernel(x_ref, w_ref, b_ref, o_ref):
    o_ref[...] = (
        jnp.dot(x_ref[...], w_ref[...], preferred_element_type=jnp.float32)
        + b_ref[...]
    ).astype(o_ref.dtype)


def _pick_tiles(M, K, N, x_bytes, w_bytes, out_bytes, budget):
    """Largest (tm, tn) divisor tiles whose double-buffered footprint fits budget."""
    tm_cands = [c for c in (2048, 1024, 512, 256, 128, 64, 32, 16, 8) if M % c == 0] or [M]
    tn_cands = [c for c in (1024, 512, 256, 128) if N % c == 0] or [N]
    for tm in tm_cands:
        for tn in tn_cands:
            need = (2 * (tm * K * x_bytes + K * tn * w_bytes + tn * 4)
                    + 2 * tm * tn * out_bytes)
            if need <= budget:
                return tm, tn
    # Fallback: smallest candidates (correct; may be tight on VMEM at huge K).
    return tm_cands[-1], tn_cands[-1]


def _matmul_bias(x, w, b, out_dtype=jnp.float32, vmem_limit=None):
    """(M, K) @ (K, N) + (1, N) -> (M, N), tiled over M and N, bf16 operands."""
    M, K = x.shape
    K2, N = w.shape
    assert K == K2
    limit = int(vmem_limit) if vmem_limit is not None else int(_vmem_budget_bytes() * 0.75)
    tm, tn = _pick_tiles(M, K, N,
                         x.dtype.itemsize, w.dtype.itemsize,
                         jnp.dtype(out_dtype).itemsize,
                         int(limit * 0.8))
    grid = (M // tm, N // tn)

    grid_spec = pltpu.PrefetchScalarGridSpec(
        num_scalar_prefetch=0,
        grid=grid,
        in_specs=[
            pl.BlockSpec((tm, K), lambda i, j: (i, 0)),   # activation tile (bf16)
            pl.BlockSpec((K, tn), lambda i, j: (0, j)),   # weight tile (bf16)
            pl.BlockSpec((1, tn), lambda i, j: (0, j)),   # bias tile (f32)
        ],
        out_specs=pl.BlockSpec((tm, tn), lambda i, j: (i, j)),
    )
    return pl.pallas_call(
        _matmul_bias_kernel,
        out_shape=jax.ShapeDtypeStruct((M, N), out_dtype),
        grid_spec=grid_spec,
        compiler_params=pltpu.CompilerParams(
            dimension_semantics=("parallel", "parallel"),
            vmem_limit_bytes=limit),
    )(x, w, b)


# ---------------------------------------------------------------------------
# Sequential LSTM recurrence kernel (batch-major).  Only h_{t-1} @ W_hh^T stays
# in the loop; the input projection arrives precomputed as bf16 pre-gates.
# Gate order along 4H has been permuted offline to [i, f, o, g].
# ---------------------------------------------------------------------------
def _lstm_recurrence_kernel(pg_ref,             # (B, CH, 4H) bf16 pre-gates chunk
                            whh_hbm,            # (H, 4H) bf16, memory_space=ANY
                            h0_ref, c0_ref,     # (B, H) f32
                            h_out_ref,          # (B, CH, H) bf16 per-step hidden
                            hT_ref, cT_ref,     # (B, H) f32 final state
                            whh_scr,            # VMEM (H, 4H) bf16, single-buffered
                            h_scr, c_scr):      # VMEM (B, H) f32 carries
    t = pl.program_id(0)
    CH = pg_ref.shape[1]
    B, H = h_scr.shape

    @pl.when(t == 0)
    def _():
        # Stage the grid-invariant W_hh^T once (no double-buffered pipeline copy).
        pltpu.sync_copy(whh_hbm, whh_scr)
        h_scr[...] = h0_ref[...].astype(jnp.float32)
        c_scr[...] = c0_ref[...].astype(jnp.float32)

    wt = whh_scr[...]  # hoisted out of the chunk loop; reused by every timestep

    # Small, fixed trip count -> static unroll is fine (chunk kept <= ~16).
    # TODO(synk): switch to lax.fori_loop(..., unroll=k) if chunk is raised further.
    for s in range(CH):
        gates = pg_ref[:, s, :].astype(jnp.float32) + jnp.dot(
            h_scr[...].astype(jnp.bfloat16), wt, preferred_element_type=jnp.float32)
        # Permuted gate order [i, f, o, g]: one contiguous sigmoid slab + one tanh.
        sig = jax.nn.sigmoid(gates[:, : 3 * H])
        i = sig[:, 0 * H:1 * H]
        f = sig[:, 1 * H:2 * H]
        o = sig[:, 2 * H:3 * H]
        g = jnp.tanh(gates[:, 3 * H:])

        c_new = f * c_scr[...] + i * g
        h_new = o * jnp.tanh(c_new)
        c_scr[...] = c_new
        h_scr[...] = h_new
        h_out_ref[:, s, :] = h_new.astype(h_out_ref.dtype)

    @pl.when(t == pl.num_programs(0) - 1)
    def _():
        hT_ref[...] = h_scr[...].astype(hT_ref.dtype)
        cT_ref[...] = c_scr[...].astype(cT_ref.dtype)


def _pick_chunk(T, B, H, budget, max_chunk=16):
    """VMEM-aware time chunk: multiple of 8 (sublane-aligned block dim) or == T."""
    per_step = 2 * (B * 4 * H * 2 + B * H * 2)       # bf16 pre-gates + h_out, x2 bufs
    resident = H * 4 * H * 2 + 2 * B * H * 4         # bf16 W_hh scratch + f32 carries
    fit = max(1, (budget - resident) // max(per_step, 1))
    limit = min(max_chunk, fit, T)
    for c in range(limit, 0, -1):
        if T % c == 0 and (c % 8 == 0 or c == T):
            return c
    return T


def _lstm_recurrence(pre_gates, whh_t_bf16, h0, c0, chunk, vmem_limit):
    B, T, G = pre_gates.shape
    H = whh_t_bf16.shape[0]
    n_chunks = T // chunk
    const = lambda t: (0, 0)

    grid_spec = pltpu.PrefetchScalarGridSpec(
        num_scalar_prefetch=0,
        grid=(n_chunks,),
        in_specs=[
            pl.BlockSpec((B, chunk, G), lambda t: (0, t, 0)),  # pre-gates chunk
            pl.BlockSpec(memory_space=pl.ANY),                 # W_hh^T stays in HBM
            pl.BlockSpec((B, H), const),                       # h0
            pl.BlockSpec((B, H), const),                       # c0
        ],
        out_specs=[
            pl.BlockSpec((B, chunk, H), lambda t: (0, t, 0)),  # hidden states
            pl.BlockSpec((B, H), const),                       # final h
            pl.BlockSpec((B, H), const),                       # final c
        ],
        scratch_shapes=[
            pltpu.VMEM((H, G), jnp.bfloat16),   # resident, single-buffered W_hh^T
            pltpu.VMEM((B, H), jnp.float32),    # h carry
            pltpu.VMEM((B, H), jnp.float32),    # c carry
        ],
    )
    return pl.pallas_call(
        _lstm_recurrence_kernel,
        out_shape=(
            jax.ShapeDtypeStruct((B, T, H), jnp.bfloat16),
            jax.ShapeDtypeStruct((B, H), jnp.float32),
            jax.ShapeDtypeStruct((B, H), jnp.float32),
        ),
        grid_spec=grid_spec,
        compiler_params=pltpu.CompilerParams(
            dimension_semantics=("arbitrary",),
            vmem_limit_bytes=int(vmem_limit)),
    )(pre_gates, whh_t_bf16, h0, c0)


# ---------------------------------------------------------------------------
# Forward pass matching RNNModule.forward(x, prev_state).
# ---------------------------------------------------------------------------
def rnn_forward(tokens, prev_state, params, time_chunk=16):
    """tokens: (B, T) int; prev_state: (h0, c0) each (1, B, H).
    Returns (logits (B, T, V), (hT, cT) each (1, B, H))."""
    emb = params["embedding"]          # (V, E)  f32
    wih_t = params["w_ih_t"]           # (E, 4H) f32
    whh_t = params["w_hh_t"]           # (H, 4H) f32
    b = params["b"]                    # (1, 4H) f32 = b_ih + b_hh
    wd_t = params["w_dense_t"]         # (H, V)  f32
    bd = params["b_dense"]             # (1, V)  f32

    B, T = tokens.shape
    V, E = emb.shape
    H = whh_t.shape[0]
    G = 4 * H

    budget = _vmem_budget_bytes()
    matmul_vmem = int(budget * 0.75)

    # Gate-order permutation [i, f, g, o] -> [i, f, o, g] (done once, outside kernels)
    # so sigmoid applies to one contiguous (B, 3H) slab inside the recurrence.
    idx = jnp.concatenate([jnp.arange(0, 2 * H),
                           jnp.arange(3 * H, 4 * H),
                           jnp.arange(2 * H, 3 * H)])
    wih_r = jnp.take(wih_t, idx, axis=1).astype(jnp.bfloat16)
    whh_r = jnp.take(whh_t, idx, axis=1).astype(jnp.bfloat16)
    b_r = jnp.take(b, idx, axis=1)                              # f32 bias

    # 1) Embedding gather in XLA (keeps (V, E) out of VMEM). Batch-major -> no transpose.
    # TODO(synk): jnp.take clamps OOB token ids; PyTorch nn.Embedding would raise.
    x = jnp.take(emb, tokens.astype(jnp.int32), axis=0)         # (B, T, E)
    x_flat = x.reshape(B * T, E).astype(jnp.bfloat16)

    # 2) Hoisted input projection: one big MXU matmul -> bf16 pre-gates (B, T, 4H).
    pre_gates = _matmul_bias(x_flat, wih_r, b_r, out_dtype=jnp.bfloat16,
                             vmem_limit=matmul_vmem).reshape(B, T, G)

    # 3) Sequential recurrence (chunked over time, VMEM-aware chunk size).
    chunk = _pick_chunk(T, B, H, int(budget * 0.5), max_chunk=time_chunk)
    h0 = prev_state[0][0].astype(jnp.float32)                   # (B, H)
    c0 = prev_state[1][0].astype(jnp.float32)                   # (B, H)
    h_all, hT, cT = _lstm_recurrence(pre_gates, whh_r, h0, c0, chunk,
                                     vmem_limit=matmul_vmem)    # h_all (B, T, H) bf16

    # 4) Hoisted vocab projection over all B*T rows; output is already (B, T, V).
    logits = _matmul_bias(h_all.reshape(B * T, H), wd_t.astype(jnp.bfloat16), bd,
                          out_dtype=jnp.float32, vmem_limit=matmul_vmem)
    logits = logits.reshape(B, T, V)

    return logits, (hT[None], cT[None])


# ---------------------------------------------------------------------------
# Pure-JAX f32 reference of the PyTorch module's forward (original gate order).
# ---------------------------------------------------------------------------
def _reference_forward(tokens, prev_state, params):
    emb = params["embedding"]
    wih_t, whh_t, b = params["w_ih_t"], params["w_hh_t"], params["b"]
    wd_t, bd = params["w_dense_t"], params["b_dense"]
    H = whh_t.shape[0]

    x = jnp.take(emb, tokens, axis=0)                     # (B, T, E)
    h, c = prev_state[0][0], prev_state[1][0]             # (B, H)

    def step(carry, x_t):
        h, c = carry
        gates = x_t @ wih_t + h @ whh_t + b               # PyTorch order [i, f, g, o]
        i = jax.nn.sigmoid(gates[:, 0 * H:1 * H])
        f = jax.nn.sigmoid(gates[:, 1 * H:2 * H])
        g = jnp.tanh(gates[:, 2 * H:3 * H])
        o = jax.nn.sigmoid(gates[:, 3 * H:4 * H])
        c = f * c + i * g
        h = o * jnp.tanh(c)
        return (h, c), h

    (hT, cT), hs = jax.lax.scan(step, (h, c), jnp.transpose(x, (1, 0, 2)))
    out = jnp.transpose(hs, (1, 0, 2))                    # (B, T, H)
    logits = out @ wd_t + bd
    return logits, (hT[None], cT[None])


def init_params(key, n_vocab, embedding_size, lstm_size):
    ks = jax.random.split(key, 6)
    H = lstm_size
    return {
        "embedding": jax.random.normal(ks[0], (n_vocab, embedding_size), jnp.float32) * 0.1,
        "w_ih_t": jax.random.normal(ks[1], (embedding_size, 4 * H), jnp.float32) * 0.1,
        "w_hh_t": jax.random.normal(ks[2], (H, 4 * H), jnp.float32) * 0.1,
        "b": jax.random.normal(ks[3], (1, 4 * H), jnp.float32) * 0.1,
        "w_dense_t": jax.random.normal(ks[4], (H, n_vocab), jnp.float32) * 0.1,
        "b_dense": jax.random.normal(ks[5], (1, n_vocab), jnp.float32) * 0.1,
    }


if __name__ == "__main__":
    n_vocab, seq_size, embedding_size, lstm_size = 64, 8, 32, 32
    batch = 2

    key = jax.random.PRNGKey(0)
    kp, kx = jax.random.split(key)
    params = init_params(kp, n_vocab, embedding_size, lstm_size)

    tokens = jax.random.randint(kx, (batch, seq_size), 0, n_vocab, dtype=jnp.int32)
    prev_state = (jnp.zeros((1, batch, lstm_size), jnp.float32),
                  jnp.zeros((1, batch, lstm_size), jnp.float32))

    logits, (hT, cT) = rnn_forward(tokens, prev_state, params)
    jax.block_until_ready((logits, hT, cT))

    ref_logits, (ref_hT, ref_cT) = _reference_forward(tokens, prev_state, params)
    assert logits.shape == (batch, seq_size, n_vocab)
    assert hT.shape == (1, batch, lstm_size) and cT.shape == (1, batch, lstm_size)
    # Kernel uses bf16 MXU operands (f32 accumulation / gate math); reference is pure
    # f32, so compare at bf16-level tolerance.
    assert jnp.allclose(logits, ref_logits, atol=1e-2, rtol=1e-2)
    assert jnp.allclose(hT, ref_hT, atol=1e-2, rtol=1e-2)
    assert jnp.allclose(cT, ref_cT, atol=1e-2, rtol=1e-2)

    print("KERNEL_OK")
</pallas_src>

<mosaic_0001>
module attributes {stable_mosaic.version = 11 : i64} {
  func.func @_matmul_bias_kernel(%arg0: i32, %arg1: i32, %arg2: memref<16x32xbf16, #tpu.memory_space<vmem>>, %arg3: memref<32x128xbf16, #tpu.memory_space<vmem>>, %arg4: memref<1x128xf32, #tpu.memory_space<vmem>>, %arg5: memref<16x128xbf16, #tpu.memory_space<vmem>>) attributes {dimension_semantics = [#tpu.dimension_semantics<parallel>, #tpu.dimension_semantics<parallel>], iteration_bounds = array<i64: 1, 1>, scalar_prefetch = 0 : i64, scratch_operands = 0 : i64, tpu.core_type = #tpu.core_type<tc>, window_params = [{transform_indices = @transform_0, window_bounds = array<i64: 16, 32>}, {transform_indices = @transform_1, window_bounds = array<i64: 32, 128>}, {transform_indices = @transform_2, window_bounds = array<i64: 1, 128>}, {transform_indices = @transform_3, window_bounds = array<i64: 16, 128>}]} {
    %c0 = arith.constant 0 : index
    %c0_0 = arith.constant 0 : index
    %0 = vector.load %arg2[%c0, %c0_0] : memref<16x32xbf16, #tpu.memory_space<vmem>>, vector<16x32xbf16>
    %c0_1 = arith.constant 0 : index
    %c0_2 = arith.constant 0 : index
    %1 = vector.load %arg3[%c0_1, %c0_2] : memref<32x128xbf16, #tpu.memory_space<vmem>>, vector<32x128xbf16>
    %cst = arith.constant dense<0.000000e+00> : vector<16x128xf32>
    %2 = tpu.matmul %0, %1, %cst {dimension_numbers = #tpu.dot_dimension_numbers<[1], [0], [0], [1], [0, 0, 1, 1], [], []>} : vector<16x32xbf16>, vector<32x128xbf16>, vector<16x128xf32> -> vector<16x128xf32>
    %c0_3 = arith.constant 0 : index
    %c0_4 = arith.constant 0 : index
    %3 = vector.load %arg4[%c0_3, %c0_4] : memref<1x128xf32, #tpu.memory_space<vmem>>, vector<1x128xf32>
    %4 = vector.broadcast %3 : vector<1x128xf32> to vector<16x128xf32>
    %5 = arith.addf %2, %4 : vector<16x128xf32>
    %6 = arith.truncf %5 : vector<16x128xf32> to vector<16x128xbf16>
    %c0_5 = arith.constant 0 : index
    %c0_6 = arith.constant 0 : index
    %7 = vector.load %arg5[%c0_5, %c0_6] : memref<16x128xbf16, #tpu.memory_space<vmem>>, vector<16x128xbf16>
    tpu.vector_store %arg5[%c0_5, %c0_6], %6 {strides = array<i32>} : memref<16x128xbf16, #tpu.memory_space<vmem>>, vector<16x128xbf16>,
    return
  }
  func.func @transform_0(%arg0: i32, %arg1: i32) -> (i32, i32) {
    %c0_i32 = arith.constant 0 : i32
    %c0_i32_0 = arith.constant 0 : i32
    return %arg0, %c0_i32 : i32, i32
  }
  func.func @transform_1(%arg0: i32, %arg1: i32) -> (i32, i32) {
    %c0_i32 = arith.constant 0 : i32
    %c0_i32_0 = arith.constant 0 : i32
    return %c0_i32, %arg1 : i32, i32
  }
  func.func @transform_2(%arg0: i32, %arg1: i32) -> (i32, i32) {
    %c0_i32 = arith.constant 0 : i32
    %c0_i32_0 = arith.constant 0 : i32
    return %c0_i32, %arg1 : i32, i32
  }
  func.func @transform_3(%arg0: i32, %arg1: i32) -> (i32, i32) {
    %c0_i32 = arith.constant 0 : i32
    return %arg0, %arg1 : i32, i32
  }
}

</mosaic_0001>

<bundles_post_ra>
// kernel: tpu_custom_call.1
= control target key start
LH: loop header
LB: loop body
LE: loop exit
PB: predicated region body
PF: predicated region fallthrough
CT: control target
= control target key end

     0   :  { %8 = vsyncpa [#allocation3], 0  ;;  %s329_s0 = inlined_call_operand.hbm [shape: bf16[16,32], index: 0, kind: input, shape index: {}]   ;;  %s330_s1 = inlined_call_operand.hbm [shape: bf16[32,128], index: 1, kind: input, shape index: {}]   ;;  %s331_s2 = inlined_call_operand.vmem [shape: f32[1,128], index: 2, kind: input, shape index: {}]   ;;  %s332_s3 = inlined_call_operand.hbm [shape: bf16[16,128], index: 3, kind: output, shape index: {}]  }
   0x1   :  { %9 = vsyncpa [#allocation6], 0 }
   0x2   :  { %10 = vsyncpa [#allocation4], 0  ;;  %s254_s12 = smov [#allocation2]   ;;  %s182_s16 = scalar_lea.hbm %s329_s0, 128 }
   0x3   :  { %s16_s13 = sshll.u32 %s254_s12, 4  ;;  %p183_p0 = scmp.ne.s32.totalorder %s329_s0, %s182_s16  ;;  %s17_s13 = int_to_ptr.vmem [resolvable:$true] %s16_s13 }
   0x4   :  { %p186_p1 = scmp.lt.u32.totalorder %s182_s16, %s329_s0 }
   0x6   :  { %p188_p2 = pnand %p186_p1, %p183_p0 }
   0x8   :  { %191 = shalt.err (!%p188_p2)
}
   0x9   :  { %s192_s21 = scalar_lea.vmem %s17_s13, 128  ;;  %p197_p4 = scmp.lt.s32.totalorder %s17_s13, %s17_s13 }
   0xa   :  { %p193_p3 = scmp.ne.s32.totalorder %s17_s13, %s192_s21  ;;  %p198_p5 = scmp.lt.s32.totalorder %s192_s21, %s192_s21 }
   0xc   :  { %p199_p6 = por %p198_p5, %p197_p4 }
   0xe   :  { %p200_p7 = pnand %p199_p6, %p193_p3 }
  0x10   :  { %203 = shalt.err (!%p200_p7)
}
  0x11   :  { %s255_s22 = smov 64   ;;  %s256_s23 = smov 4  }
  0x12   :  { %22 = dma.hbm_to_vmem [thread:$0]  %s329_s0, 128, %s17_s13, [#allocation3], %s255_s22, %s255_s22, %s256_s23  }
  0x13   :  { %s257_s26 = smov [#allocation5]   ;;  %s204_s30 = scalar_lea.hbm %s330_s1, 256 }
  0x14   :  { %s28_s27 = sshll.u32 %s257_s26, 4  ;;  %p205_p8 = scmp.ne.s32.totalorder %s330_s1, %s204_s30  ;;  %s29_s27 = int_to_ptr.vmem [resolvable:$true] %s28_s27 }
  0x15   :  { %p208_p9 = scmp.lt.u32.totalorder %s204_s30, %s330_s1 }
  0x17   :  { %p210_p10 = pnand %p208_p9, %p205_p8 }
  0x19   :  { %213 = shalt.err (!%p210_p10)
}
  0x1a   :  { %s214_s8 = scalar_lea.vmem %s29_s27, 256  ;;  %p219_p12 = scmp.lt.s32.totalorder %s29_s27, %s29_s27 }
  0x1b   :  { %p215_p11 = scmp.ne.s32.totalorder %s29_s27, %s214_s8  ;;  %p220_p13 = scmp.lt.s32.totalorder %s214_s8, %s214_s8 }
  0x1d   :  { %p221_p0 = por %p220_p13, %p219_p12 }
  0x1f   :  { %p222_p1 = pnand %p221_p0, %p215_p11 }
  0x21   :  { %225 = shalt.err (!%p222_p1)
}
  0x22   :  { %34 = dma.hbm_to_vmem [thread:$0]  %s330_s1, 256, %s29_s27, [#allocation6], %s255_s22, %s255_s22, %s256_s23  }
  0x23   :  { %248 = dma.done.wait [#allocation3], 128  }
  0x24   :  { %249 = vsyncadd [#allocation3], 4294967168 }
  0x25   :  { %250 = dma.done.wait [#allocation6], 256  }
  0x26   :  { %251 = vsyncadd [#allocation6], 4294967040  ;;  %v258_v0 = vmov 0.0   ;;  %vm259_vm0 = vmmov 0   ;;  %v179_v1 = vld [vmem:[#allocation5] sm:$0xff]   ;;  %v180_v2 = vld [vmem:[#allocation5 + $0x8] sm:$0xff]  }
  0x27   :  { %164 = vmatprep.subr.bf16.mxu0 %v258_v0  ;;  %168 = vmatprep.mubr.msk.bf16.mxu0 %vm259_vm0, %v258_v0  ;;  %v181_v3 = vld [vmem:[#allocation2] sm:$0xff]   ;;  %vm74_vm1 = vcmask 261120   ;;  %s260_s1 = smov [#allocation7]  }
  0x28   :  { %165 = vmatpush3.bf16.msra.mxu0 %v179_v1  ;;  %v147_v4 = vld [vmem:[%s331_s2] ss:$0 sm:$0xff]  ;;  %s134_s12 = sshll.u32 %s260_s1, 4  ;;  %s135_s12 = int_to_ptr.vmem [resolvable:$true] %s134_s12 }
  0x29   :  { %166 = vmatprep.subr.bf16.mxu0 %v258_v0  ;;  %s226_s13 = scalar_lea.vmem %s135_s12, 128  ;;  %p231_p3 = scmp.lt.s32.totalorder %s135_s12, %s135_s12 }
  0x2a   :  { %p227_p2 = scmp.ne.s32.totalorder %s135_s12, %s226_s13  ;;  %p232_p4 = scmp.lt.s32.totalorder %s226_s13, %s226_s13 }
  0x2c   :  { %167 = vmatpush3.bf16.msra.mxu0 %v180_v2  ;;  %p233_p5 = por %p232_p4, %p231_p3 }
  0x2e   :  { %p234_p6 = pnand %p233_p5, %p227_p2 }
  0x2f   :  { %169 = vmatmul.mubr.msk.bf16.vlgmr.msra.gmra.mrb[0].mxu0 %vm74_vm1, %v181_v3 }
 0x102   :  { %v112_v5 = vpop.f32.mrb[0].mxu0 }
 0x103   :  { %v170_v6 = vpop.f32.mrb[1].mxu0  ;;  %v113_v8 = vadd.f32 %v147_v4, %v112_v5 }
 0x104   :  { %v115_v7 = vpop.f32.mrb[2].mxu0 }
 0x105   :  { %v116_v9 = vadd.f32 %v147_v4, %v115_v7  ;;  %v171_v10 = vpop.f32.mrb[3].mxu0 }
 0x107   :  { %v159_v11 = vpack.c.bf16 %v116_v9, %v113_v8 }
 0x109   :  { %160 = vst [vmem:[#allocation7] sm:$0xff] %v159_v11  }
 0x10a   :  { %237 = shalt.err (!%p234_p6)
}
 0x10b   :  { %s238_s15 = scalar_lea.hbm %s332_s3, 128 }
 0x10c   :  { %p239_p7 = scmp.ne.s32.totalorder %s332_s3, %s238_s15  ;;  %p242_p8 = scmp.lt.u32.totalorder %s238_s15, %s332_s3 }
 0x10e   :  { %p244_p9 = pnand %p242_p8, %p239_p7 }
 0x110   :  { %247 = shalt.err (!%p244_p9)
}
 0x111   :  { %140 = dma.vmem_to_hbm [thread:$0]  %s135_s12, 128, %s332_s3, [#allocation4], %s255_s22, %s255_s22, %s256_s23  }
 0x112   :  { %252 = dma.done.wait [#allocation4], 128  }
 0x113   :  { %253 = vsyncadd [#allocation4], 4294967168 }
 0x114   :  { %144 = vsyncpa [#allocation3], 1 }
 0x115   :  { %145 = vsyncpa [#allocation6], 1 }
 0x116   :  { %146 = vsyncpa [#allocation4], 1 }

</bundles_post_ra>
